<compile_context>
chip_gen: v5e
topology: v5e:2x2
jax: 0.10.0
libtpu: 0.0.40
codegen_flags: <defaults>
</compile_context>

<pallas_src>
import functools

import jax
import jax.numpy as jnp
from jax.experimental import pallas as pl
from jax.experimental.pallas import tpu as pltpu


def _patchify_kernel(x_ref, o_ref, *, C, p, w):
    # x_ref block: (1, C, 1, p, W) with W = w*p   (lane axis = W -> dense loads)
    # o_ref block: (1, 1, w, C*p*p)               (lane axis = C*p*p -> dense stores)
    cp = C * p
    W = w * p

    x = x_ref[0, :, 0]                    # (C, p1, W)
    a = x.reshape(cp, W)                  # (C*p1, W)    merge leading dims, lane unchanged
    t = jnp.swapaxes(a, 0, 1)             # (W, C*p1)    single 2-D XLU transpose
    r = t.reshape(w, p, cp)               # (w, p2, C*p1) split sublane W -> (w, p2), lane unchanged
    s = jnp.swapaxes(r, 1, 2)             # (w, C*p1, p2) batched swap of the two minor dims
    # Row-major merge of the last two dims gives lane order (c, p1, p2) == (c p1 p2).
    o_ref[...] = s.reshape(1, 1, w, cp * p)


def patcher_forward(x, patch_size):
    """Patcher(patch_size, C).forward(x) for NCHW x: (B,C,H,W) -> (B, S, C*p*p)."""
    B, C, H, W = x.shape
    p = patch_size
    assert H % p == 0 and W % p == 0, "H and W must be divisible by patch_size"
    h, w = H // p, W // p
    cpp = C * p * p

    # Free metadata reshape (row-major split of H) so that every BlockSpec block
    # keeps its last two dims equal to the full array dims, for any patch size.
    x5 = x.reshape(B, C, h, p, W)

    out4 = pl.pallas_call(
        functools.partial(_patchify_kernel, C=C, p=p, w=w),
        out_shape=jax.ShapeDtypeStruct((B, h, w, cpp), x.dtype),
        grid=(B, h),
        in_specs=[pl.BlockSpec((1, C, 1, p, W), lambda b, i: (b, 0, i, 0, 0))],
        out_specs=pl.BlockSpec((1, 1, w, cpp), lambda b, i: (b, i, 0, 0)),
        compiler_params=pltpu.CompilerParams(
            dimension_semantics=("parallel", "parallel")),
    )(x5)

    # Free row-major merge of (h, w) -> S = h*w: no data movement.
    return out4.reshape(B, h * w, cpp)


def _reference(x, patch_size):
    # Pure-JAX reference of einops 'b c (h p1) (w p2) -> b (h w) (c p1 p2)'.
    B, C, H, W = x.shape
    p = patch_size
    h, w = H // p, W // p
    y = x.reshape(B, C, h, p, w, p)
    y = jnp.transpose(y, (0, 2, 4, 1, 3, 5))  # b h w c p1 p2
    return y.reshape(B, h * w, C * p * p)


if __name__ == "__main__":
    key = jax.random.PRNGKey(0)
    configs = [
        # (B, C, H, W, patch_size)
        (2, 16, 32, 32, 4),   # lane-dense output rows: C*p*p = 256
        (2, 4, 16, 16, 4),    # small config matching the original example shapes
    ]
    for (B, C, H, W, p) in configs:
        key, sub = jax.random.split(key)
        x = jax.random.normal(sub, (B, C, H, W), dtype=jnp.float32)

        out = jax.block_until_ready(patcher_forward(x, p))
        ref = _reference(x, p)

        expected_shape = (B, (H // p) * (W // p), C * p * p)
        assert out.shape == expected_shape, (out.shape, expected_shape)
        # Pure permutation -> exact equality (no arithmetic performed).
        assert bool(jnp.array_equal(out, ref)), f"mismatch for config {(B, C, H, W, p)}"

    print("KERNEL_OK")
</pallas_src>

<mosaic_0001>
module attributes {stable_mosaic.version = 11 : i64} {
  func.func @_patchify_kernel(%arg0: i32, %arg1: i32, %arg2: memref<1x16x1x4x32xf32, #tpu.memory_space<vmem>>, %arg3: memref<1x1x8x256xf32, #tpu.memory_space<vmem>>) attributes {dimension_semantics = [#tpu.dimension_semantics<parallel>, #tpu.dimension_semantics<parallel>], iteration_bounds = array<i64: 2, 8>, scalar_prefetch = 0 : i64, scratch_operands = 0 : i64, tpu.core_type = #tpu.core_type<tc>, window_params = [{transform_indices = @transform_0, window_bounds = array<i64: 1, 16, 1, 4, 32>}, {transform_indices = @transform_1, window_bounds = array<i64: 1, 1, 8, 256>}]} {
    %c0 = arith.constant 0 : index
    %c0_0 = arith.constant 0 : index
    %c0_1 = arith.constant 0 : index
    %c0_2 = arith.constant 0 : index
    %c0_3 = arith.constant 0 : index
    %0 = vector.load %arg2[%c0, %c0_0, %c0_1, %c0_2, %c0_3] : memref<1x16x1x4x32xf32, #tpu.memory_space<vmem>>, vector<1x16x1x4x32xf32>
    %1 = vector.shape_cast %0 : vector<1x16x1x4x32xf32> to vector<16x4x32xf32>
    %2 = vector.shape_cast %1 : vector<16x4x32xf32> to vector<64x32xf32>
    %3 = tpu.transpose %2, [1, 0] : vector<64x32xf32> -> vector<32x64xf32>
    %4 = vector.shape_cast %3 : vector<32x64xf32> to vector<8x4x64xf32>
    %5 = tpu.transpose %4, [0, 2, 1] : vector<8x4x64xf32> -> vector<8x64x4xf32>
    %6 = vector.shape_cast %5 : vector<8x64x4xf32> to vector<1x1x8x256xf32>
    %c0_4 = arith.constant 0 : index
    %c0_5 = arith.constant 0 : index
    %c0_6 = arith.constant 0 : index
    %c0_7 = arith.constant 0 : index
    %7 = vector.load %arg3[%c0_4, %c0_5, %c0_6, %c0_7] : memref<1x1x8x256xf32, #tpu.memory_space<vmem>>, vector<1x1x8x256xf32>
    tpu.vector_store %arg3[%c0_4, %c0_5, %c0_6, %c0_7], %6 {strides = array<i32>} : memref<1x1x8x256xf32, #tpu.memory_space<vmem>>, vector<1x1x8x256xf32>,
    return
  }
  func.func @transform_0(%arg0: i32, %arg1: i32) -> (i32, i32, i32, i32, i32) {
    %c0_i32 = arith.constant 0 : i32
    %c0_i32_0 = arith.constant 0 : i32
    %c0_i32_1 = arith.constant 0 : i32
    %c0_i32_2 = arith.constant 0 : i32
    return %arg0, %c0_i32, %arg1, %c0_i32_0, %c0_i32_1 : i32, i32, i32, i32, i32
  }
  func.func @transform_1(%arg0: i32, %arg1: i32) -> (i32, i32, i32, i32) {
    %c0_i32 = arith.constant 0 : i32
    %c0_i32_0 = arith.constant 0 : i32
    %c0_i32_1 = arith.constant 0 : i32
    return %arg0, %arg1, %c0_i32, %c0_i32_0 : i32, i32, i32, i32
  }
}

</mosaic_0001>

<bundles_post_ra>
// kernel: tpu_custom_call.1
= control target key start
LH: loop header
LB: loop body
LE: loop exit
PB: predicated region body
PF: predicated region fallthrough
CT: control target
= control target key end

     0   :  { %6 = vsyncpa [#allocation3], 0  ;;  %s3160_s0 = inlined_call_operand.hbm [shape: f32[2,16,8,4,32], index: 0, kind: input, shape index: {}]   ;;  %s3161_s1 = inlined_call_operand.hbm [shape: f32[2,8,8,256], index: 1, kind: output, shape index: {}]  }
   0x1   :  { %8 = vsyncpa [#allocation3 + $0x1], 0 }
   0x2   :  { %9 = vsyncpa [#allocation4], 0 }
   0x3   :  { %11 = vsyncpa [#allocation4 + $0x1], 0  ;;  %s2177_s6 = smov 0   ;;  %s2179_s7 = smov 0  }
   0x4   :  { %s2181_s8 = smov 0   ;;  %s2183_s9 = smov 0  }
   0x5   :  { %s2185_s10 = smov 0   ;;  %s2187_s11 = smov 0  }
   0x6   :  { %s2189_s12 = smov 0   ;;  %s2191_s13 = smov 0  }
   0x7 LB: > { %s1870_s14 = sadd.s32 4294967295, %s2129_s13   ;;  %s1871_s15 = sadd.s32 4294967294, %s2129_s13   ;;  %s2129_s13 = sphi %s2191_s13, %s17_s13   ;;  %s2125_s12 = sphi %s2189_s12, %s3233_s12   ;;  %s2121_s11 = sphi %s2187_s11, %s3232_s11   ;;  %s2117_s10 = sphi %s2185_s10, %s3231_s10   ;;  %s2113_s9 = sphi %s2183_s9, %s3230_s9   ;;  %s2109_s8 = sphi %s2181_s8, %s3229_s8   ;;  %s2105_s7 = sphi %s2179_s7, %s3228_s7   ;;  %s2101_s6 = sphi %s2177_s6, %s3227_s6  }
   0x8   : > { %s26_s16 = sadd.s32 1, %s2121_s11  ;;  %s29_s17 = sadd.s32 1, %s2125_s12 }
   0x9   : > { %p27_p0 = scmp.ge.s32.totalorder %s26_s16, 8  ;;  %s38_s18 = sadd.s32 1, %s2109_s8 }
   0xa   : > { %p45_p1 = scmp.ne.s32.totalorder %s2109_s8, %s2105_s7  ;;  %p46_p2 = scmp.eq.s32.totalorder %s2129_s13, 0 }
   0xb   : > { %s3235_s16 = smov (%p27_p0, %s26_s16), 0  ;;  %s3237_s17 = smov (!%p27_p0, %s29_s17), %s2125_s12 }
   0xc   : > { %s34_s19 = ssub.s32 %s2121_s11, %s3235_s16  ;;  %p2230_p3 = por %p46_p2, %p45_p1 }
   0xd   : > { %p31_p4 = scmp.ge.s32.totalorder %s3237_s17, 2  ;;  %p51_p5 = scmp.ne.s32.totalorder %s2105_s7, %s2101_s6 }
   0xe   : > { %p52_p6 = scmp.eq.s32.totalorder %s1870_s14, 0  ;;  %p77_p7 = scmp.eq.s32.totalorder %s1870_s14, 15 }
   0xf   : > { %s3239_s17 = smov (%p31_p4, %s3237_s17), 0  ;;  %p83_p10 = scmp.eq.s32.totalorder %s1871_s15, 15 }
  0x10   : > { %3193 = sst [smem:[#allocation8_spill]] %s3239_s17  ;;  %p2238_p8 = por %p52_p6, %p51_p5 }
  0x11   : > { %p2242_p9 = por %p77_p7, %p45_p1  ;;  %s33_s23 = ssub.s32 %s2125_s12, %s3239_s17 }
  0x12   : > { %s35_s24 = sor.u32 %s34_s19, %s33_s23  ;;  %p2248_p12 = por %p83_p10, %p51_p5 }
  0x13   : > { %p36_p11 = scmp.eq.s32.totalorder %s35_s24, 0  ;;  %p1898_p13 = scmp.lt.s32.totalorder %s2129_s13, 16 }
  0x14   : > { %s103_s26 = sand.u32 1, %s2109_s8   ;;  %s1875_s29 = sshll.u32 %s2125_s12, 7 }
  0x15   : > { %s2255_s27 = scalar_select %p36_p11, %s2109_s8, %s38_s18  }
  0x16   : > { %s1874_s28 = sshll.u32 %s103_s26, 6  ;;  %s111_s30 = sadd.s32 %s2121_s11, %s1875_s29 }
  0x17   : > { %s107_s2 = scalar_lea.vmem [#allocation2], %s1874_s28  ;;  %s1876_s4 = sshll.u32 %s111_s30, 2 }
  0x18   : > { %s116_s3 = sshll.u32 %s107_s2, 4  ;;  %s113_s15 = scalar_lea.hbm %s3160_s0, %s1876_s4  ;;  %s117_s3 = int_to_ptr.vmem [resolvable:$true] %s116_s3 }
  0x19   : > { %p1891_p0 = pnand %p1898_p13, %p2230_p3  ;;  %s114_s19 = sshll.u32 %s113_s15, 4  ;;  %s115_s19 = int_to_ptr.hbm [resolvable:$true] %s114_s19 }
  0x1a   : > { %s104_s23 = scalar_lea.sflag [#allocation3], %s103_s26  ;;  %s2131_s18 = smov 512  }
  0x1b   : > { %s2132_s24 = smov 64   ;;  %s2133_s17 = smov 4  }
  0x1c   : > { %1893 = dma.hbm_to_vmem [thread:$0]  (!%p1891_p0), %s115_s19, 1024, %s117_s3, %s104_s23, %s2131_s18, %s2132_s24, %s2133_s17  }
  0x1d   : > { %p1877_p1 = scmp.ge.s32.totalorder %s2129_s13, 1  ;;  %p124_p2 = scmp.lt.s32.totalorder %s2129_s13, 17 }
  0x1f   : > { %p125_p4 = pnand %p1877_p1, %p124_p2 }
  0x20   : > { %s2267_s28 = sand.u32 (!%p125_p4), 1, %s2105_s7  }
  0x21   : > { %128 = sbr.rel (%p125_p4) target bundleno = 808 (0x328), region = 24  ;;  %s1878_s29 = sshll.u32 (!%p125_p4), %s2267_s28, 6 }
  0x22   : > { %s131_s20 = scalar_lea.sflag (!%p125_p4), [#allocation3], %s2267_s28  ;;  %s2271_s30 = scalar_lea.vmem (!%p125_p4), [#allocation2], %s1878_s29 }
  0x26   : > { %2092 = dma.done.wait (%p2238_p8), %s131_s20, 1024  }
  0x27   : > { %2094 = vsyncadd (%p2238_p8), %s131_s20, 4294966272  ;;  %v154_v0 = vld [vmem:[%s2271_s30] sm:$0xf]  ;;  %v155_v1 = vld [vmem:[%s2271_s30 + $0x4] sm:$0xf]  ;;  %vm526_vm0 = vcmask 1047556  }
  0x28   : > { %186 = vst [vmem:[#allocation1] ss:$2 sm:$0xff] %v154_v0  ;;  %v156_v2 = vld [vmem:[%s2271_s30 + $0x8] sm:$0xf]  ;;  %v157_v3 = vld [vmem:[%s2271_s30 + $0xc] sm:$0xf] }
  0x29   : > { %188 = vst [vmem:[#allocation1 + $0x1] ss:$2 sm:$0xff] %v155_v1  ;;  %v158_v4 = vld [vmem:[%s2271_s30 + $0x10] sm:$0xf]  ;;  %v159_v5 = vld [vmem:[%s2271_s30 + $0x14] sm:$0xf] }
  0x2a   : > { %190 = vst [vmem:[#allocation1 + $0x10] ss:$2 sm:$0xff] %v156_v2  ;;  %v160_v6 = vld [vmem:[%s2271_s30 + $0x18] sm:$0xf]  ;;  %v161_v7 = vld [vmem:[%s2271_s30 + $0x1c] sm:$0xf] }
  0x2b   : > { %192 = vst [vmem:[#allocation1 + $0x11] ss:$2 sm:$0xff] %v157_v3  ;;  %v162_v8 = vld [vmem:[%s2271_s30 + $0x20] sm:$0xf]  ;;  %v163_v9 = vld [vmem:[%s2271_s30 + $0x24] sm:$0xf] }
  0x2c   : > { %194 = vst [vmem:[#allocation1 + $0x20] ss:$2 sm:$0xff] %v158_v4  ;;  %v164_v10 = vld [vmem:[%s2271_s30 + $0x28] sm:$0xf]  ;;  %v165_v12 = vld [vmem:[%s2271_s30 + $0x2c] sm:$0xf] }
  0x2d   : > { %196 = vst [vmem:[#allocation1 + $0x21] ss:$2 sm:$0xff] %v159_v5  ;;  %v166_v13 = vld [vmem:[%s2271_s30 + $0x30] sm:$0xf]  ;;  %v167_v15 = vld [vmem:[%s2271_s30 + $0x34] sm:$0xf] }
  0x2e   : > { %198 = vst [vmem:[#allocation1 + $0x30] ss:$2 sm:$0xff] %v160_v6  ;;  %v168_v16 = vld [vmem:[%s2271_s30 + $0x38] sm:$0xf]  ;;  %v169_v18 = vld [vmem:[%s2271_s30 + $0x3c] sm:$0xf] }
  0x2f   : > { %200 = vst [vmem:[#allocation1 + $0x31] ss:$2 sm:$0xff] %v161_v7  ;;  %s2136_s17 = smov 4   ;;  %s2137_s21 = smov 12   ;;  %vm1670_vm1 = vcmask 31744   ;;  %vm1672_vm2 = vcmask 64512  }
  0x30   : > { %v201_v11 = vld.sshfl [vmem:[#allocation1] sm:$0xff pattern:$0x75316420]  ;;  %s2138_s26 = smov 8   ;;  %s2139_s2 = smov 24   ;;  %vm1674_vm3 = vcmask 97280  }
  0x31   : > { %225 = vxpose.xlu0.b32.start [1/8] (short) (narrow) %v201_v11, 32  ;;  %205 = vst [vmem:[#allocation1] ss:$2 sm:$0xff] %v162_v8  ;;  %s2140_s3 = smov 32   ;;  %s2141_s4 = smov 16   ;;  %vm1676_vm4 = vcmask 130048  }
  0x32   : > { %206 = vst [vmem:[#allocation1 + $0x1] ss:$2 sm:$0xff] %v163_v9  ;;  %v202_v14 = vld.sshfl [vmem:[#allocation1 + $0x10] sm:$0xff pattern:$0x75316420]  ;;  %s3173_s5 = smov 36  }
  0x33   : > { %207 = vst [vmem:[#allocation1 + $0x10] ss:$2 sm:$0xff] %v164_v10  ;;  %s2143_s14 = smov 44   ;;  %s2144_s15 = smov 20   ;;  %vm1678_vm5 = vcmask 162816   ;;  %vm1680_vm6 = vcmask 195584  }
  0x34   : > { %208 = vst [vmem:[#allocation1 + $0x11] ss:$2 sm:$0xff] %v165_v12  ;;  %v203_v17 = vld.sshfl [vmem:[#allocation1 + $0x20] sm:$0xff pattern:$0x75316420]  ;;  %s3166_s19 = smov 48  }
  0x35   : > { %209 = vst [vmem:[#allocation1 + $0x20] ss:$2 sm:$0xff] %v166_v13  ;;  %s2146_s23 = smov 56   ;;  %s2147_s18 = smov 28   ;;  %vm1682_vm7 = vcmask 228352   ;;  %vm1684_vm8 = vcmask 261120  }
  0x36   : > { %210 = vst [vmem:[#allocation1 + $0x21] ss:$2 sm:$0xff] %v167_v15  ;;  %v204_v19 = vld.sshfl [vmem:[#allocation1 + $0x30] sm:$0xff pattern:$0x75316420]  ;;  %s3163_s24 = smov 60  }
  0x37   : > { %211 = vst [vmem:[#allocation1 + $0x30] ss:$2 sm:$0xff] %v168_v16  ;;  %s3169_s29 = smov 68   ;;  %s2150_s20 = smov 40   ;;  %vm3183_vm9 = vcmask 293888   ;;  %vm3179_vm10 = vcmask 326656  }
  0x38   : > { %212 = vst [vmem:[#allocation1 + $0x31] ss:$2 sm:$0xff] %v169_v18  ;;  %s3164_s30 = smov 72   ;;  %vm3176_vm11 = vcmask 359424   ;;  %vm3177_vm12 = vcmask 392192   ;;  %vm3178_vm13 = vcmask 424960  }
  0x39   : > { %226 = vxpose.xlu0.b32.cont [2/8] (short) (narrow) %v202_v14, 32  ;;  %v213_v20 = vld.sshfl [vmem:[#allocation1] sm:$0xff pattern:$0x75316420]  ;;  %vm3180_vm14 = vcmask 457728   ;;  %vm3181_vm15 = vcmask 490496  }
  0x3b   : > { %v214_v21 = vld.sshfl [vmem:[#allocation1 + $0x10] sm:$0xff pattern:$0x75316420] }
  0x3d   : > { %v215_v22 = vld.sshfl [vmem:[#allocation1 + $0x20] sm:$0xff pattern:$0x75316420] }
  0x3f   : > { %v216_v23 = vld.sshfl [vmem:[#allocation1 + $0x30] sm:$0xff pattern:$0x75316420] }
  0x41   : > { %227 = vxpose.xlu0.b32.cont [3/8] (short) (narrow) %v203_v17, 32  ;;  %v2134_v17 = vmov 1983009808  }
  0x42   : > { %v531_v18 = vunpack.c.l.s4 %v2134_v17 }
  0x49   : > { %228 = vxpose.xlu0.b32.cont [4/8] (short) (narrow) %v204_v19, 32 }
  0x51   : > { %229 = vxpose.xlu0.b32.cont [5/8] (short) (narrow) %v213_v20, 32 }
  0x59   : > { %230 = vxpose.xlu0.b32.cont [6/8] (short) (narrow) %v214_v21, 32 }
  0x61   : > { %231 = vxpose.xlu0.b32.cont [7/8] (short) (narrow) %v215_v22, 32  ;;  %v2343_v22 = vunpack.c.0.s8 %v531_v18 }
  0x69   : > { %232 = vxpose.xlu0.b32.end [8/8] (short) (narrow) %v216_v23, 32 }
  0xd5   : > { %v241_v24 = vpop.trf.xlu0 }
  0xd6   : > { %269 = vxpose.xlu1.b32.start.end [1/1] (short) (narrow) %v241_v24, 64  ;;  %v261_v27 = vrot.slane %v241_v24, 4 }
  0xdd   : > { %v242_v25 = vpop.trf.xlu0 }
  0xde   : > { %333 = vxpose.xlu2.b32.start.end [1/1] (short) (narrow) %v242_v25, 64  ;;  %v262_v28 = vrot.slane %v242_v25, 4 }
  0xe5   : > { %v243_v26 = vpop.trf.xlu0 }
  0xe6   : > { %397 = vxpose.xlu0.b32.start.end [1/1] (short) (narrow) %v243_v26, 64  ;;  %v263_v29 = vrot.slane %v243_v26, 4 }
  0xed   : > { %v244_v30 = vpop.trf.xlu0 }
  0xee   : > { %v264_v31 = vrot.slane %v244_v30, 4 }
 0x116   : > { %301 = vxpose.xlu1.b32.start.end [1/1] (short) (narrow) %v261_v27, 64 }
 0x11e   : > { %365 = vxpose.xlu2.b32.start.end [1/1] (short) (narrow) %v262_v28, 64 }
 0x126   : > { %429 = vxpose.xlu0.b32.start.end [1/1] (short) (narrow) %v263_v29, 64 }
 0x156   : > { %461 = vxpose.xlu1.b32.start.end [1/1] (short) (narrow) %v244_v30, 64 }
 0x15e   : > { %493 = vxpose.xlu2.b32.start.end [1/1] (short) (narrow) %v264_v31, 64 }
 0x177   : > { %v349_v32 = vpop.trf.xlu2 }
 0x178   : > { %v525_v33 = vrot.slane %v349_v32, 4 }
 0x17a   : > { %v285_v34 = vpop.trf.xlu1 }
 0x17b   : > { %v2294_v35 = vsel %vm526_vm0, %v525_v33, %v285_v34  ;;  %v528_v36 = vrot.slane %v285_v34, 4 }
 0x17d   : > { %v529_v37 = vsel %vm526_vm0, %v349_v32, %v528_v36 }
 0x17e   : > { %v537_v24 = vperm.slane %v529_v37, %v2343_v22 }
 0x17f   : > { %v350_v38 = vpop.trf.xlu2 }
 0x180   : > { %v638_v39 = vrot.slane %v350_v38, 4  ;;  %v588_v28 = vrot.slane %v537_v24, 4 }
 0x182   : > { %v286_v40 = vpop.trf.xlu1 }
 0x183   : > { %v639_v41 = vsel %vm526_vm0, %v638_v39, %v286_v40  ;;  %v640_v42 = vrot.slane %v286_v40, 4 }
 0x184   : > { %v645_v31 = vperm.slane %v639_v41, %v2343_v22 }
 0x185   : > { %v641_v43 = vsel %vm526_vm0, %v350_v38, %v640_v42 }
 0x186   : > { %v649_v38 = vperm.slane %v641_v43, %v2343_v22  ;;  %v688_v42 = vrot.slane %v645_v31, 4 }
 0x187   : > { %v351_v44 = vpop.trf.xlu2 }
 0x188   : > { %v750_v45 = vrot.slane %v351_v44, 4 }
 0x18a   : > { %v287_v46 = vpop.trf.xlu1  ;;  %v2317_v0 = vpop.trf.xlu0 }
 0x18b   : > { %v2300_v47 = vsel %vm526_vm0, %v750_v45, %v287_v46  ;;  %v752_v48 = vrot.slane %v287_v46, 4 }
 0x18d   : > { %v2303_v49 = vsel %vm526_vm0, %v351_v44, %v752_v48 }
 0x18f   : > { %v352_v50 = vpop.trf.xlu2 }
 0x190   : > { %v862_v51 = vrot.slane %v352_v50, 4 }
 0x192   : > { %v288_v52 = vpop.trf.xlu1  ;;  %v2328_v10 = vpop.trf.xlu0 }
 0x193   : > { %v2306_v53 = vsel %vm526_vm0, %v862_v51, %v288_v52  ;;  %v864_v54 = vrot.slane %v288_v52, 4  ;;  %v757_v52 = vperm.slane %v2300_v47, %v2343_v22 }
 0x195   : > { %v2309_v55 = vsel %vm526_vm0, %v352_v50, %v864_v54  ;;  %v700_v50 = vrot.slane %v649_v38, 4 }
 0x197   : > { %v353_v56 = vpop.trf.xlu2 }
 0x198   : > { %v974_v57 = vrot.slane %v353_v56, 4 }
 0x19a   : > { %v289_v58 = vpop.trf.xlu1  ;;  %v2339_v20 = vpop.trf.xlu0 }
 0x19b   : > { %v2312_v59 = vsel %vm526_vm0, %v974_v57, %v289_v58  ;;  %v976_v60 = vrot.slane %v289_v58, 4 }
 0x19d   : > { %v2315_v61 = vsel %vm526_vm0, %v353_v56, %v976_v60 }
 0x19f   : > { %v354_v62 = vpop.trf.xlu2 }
 0x1a0   : > { %v1086_v63 = vrot.slane %v354_v62, 4 }
 0x1a2   : > { %v290_v1 = vpop.trf.xlu1  ;;  %v2352_v30 = vpop.trf.xlu0 }
 0x1a3   : > { %v2320_v2 = vsel %vm526_vm0, %v1086_v63, %v290_v1  ;;  %v1088_v3 = vrot.slane %v290_v1, 4  ;;  %v761_v63 = vperm.slane %v2303_v49, %v2343_v22 }
 0x1a5   : > { %v2323_v4 = vsel %vm526_vm0, %v354_v62, %v1088_v3  ;;  %v800_v3 = vrot.slane %v757_v52, 4 }
 0x1a7   : > { %v355_v5 = vpop.trf.xlu2 }
 0x1a8   : > { %v1198_v6 = vrot.slane %v355_v5, 4 }
 0x1aa   : > { %v291_v7 = vpop.trf.xlu1  ;;  %v2374_v57 = vpop.trf.xlu0 }
 0x1ab   : > { %v2326_v8 = vsel %vm526_vm0, %v1198_v6, %v291_v7  ;;  %v1200_v9 = vrot.slane %v291_v7, 4 }
 0x1ad   : > { %v2331_v11 = vsel %vm526_vm0, %v355_v5, %v1200_v9 }
 0x1af   : > { %v356_v12 = vpop.trf.xlu2 }
 0x1b0   : > { %v1310_v13 = vrot.slane %v356_v12, 4 }
 0x1b2   : > { %v292_v14 = vpop.trf.xlu1 }
 0x1b3   : > { %v2334_v15 = vsel %vm526_vm0, %v1310_v13, %v292_v14  ;;  %v1312_v16 = vrot.slane %v292_v14, 4  ;;  %v812_v13 = vrot.slane %v761_v63, 4 }
 0x1b5   : > { %v2337_v19 = vsel %vm526_vm0, %v356_v12, %v1312_v16  ;;  %v869_v16 = vperm.slane %v2306_v53, %v2343_v22 }
 0x1b7   : > { %v2341_v21 = vpop.trf.xlu2  ;;  %v912_v53 = vrot.slane %v869_v16, 4 }
 0x1ba   : > { %v2345_v23 = vpop.trf.xlu1 }
 0x1bb   : > { %v540_v25 = vrot.slane %v2345_v23, 4 }
 0x1bd   : > { %v541_v26 = vsel %vm526_vm0, %v2341_v21, %v540_v25  ;;  %v873_v25 = vperm.slane %v2309_v55, %v2343_v22 }
 0x1be   : > { %v549_v27 = vperm.slane %v541_v26, %v2343_v22 }
 0x1bf   : > { %v382_v29 = vpop.trf.xlu2 }
 0x1c0   : > { %v586_v32 = vrot.slane %v549_v27, 4  ;;  %v650_v33 = vrot.slane %v382_v29, 4  ;;  %v2356_v34 = vsel %vm526_vm0, %v549_v27, %v588_v28 }
 0x1c2   : > { %v318_v36 = vpop.trf.xlu1  ;;  %v2359_v37 = vsel %vm526_vm0, %v586_v32, %v537_v24 }
 0x1c3   : > { %v651_v39 = vsel %vm526_vm0, %v650_v33, %v318_v36  ;;  %v652_v40 = vrot.slane %v318_v36, 4  ;;  %v924_v36 = vrot.slane %v873_v25, 4 }
 0x1c4   : > { %v657_v44 = vperm.slane %v651_v39, %v2343_v22 }
 0x1c5   : > { %v653_v45 = vsel %vm526_vm0, %v382_v29, %v652_v40  ;;  %v981_v40 = vperm.slane %v2312_v59, %v2343_v22 }
 0x1c6   : > { %v661_v41 = vperm.slane %v653_v45, %v2343_v22  ;;  %v686_v46 = vrot.slane %v657_v44, 4  ;;  %v2367_v48 = vsel %vm526_vm0, %v657_v44, %v688_v42 }
 0x1c7   : > { %v383_v51 = vpop.trf.xlu2  ;;  %v1024_v59 = vrot.slane %v981_v40, 4 }
 0x1c8   : > { %v698_v43 = vrot.slane %v661_v41, 4  ;;  %v762_v54 = vrot.slane %v383_v51, 4  ;;  %v2372_v56 = vsel %vm526_vm0, %v686_v46, %v645_v31  ;;  %v2377_v58 = vsel %vm526_vm0, %v661_v41, %v700_v50  ;;  %v2405_v31 = vpop.trf.xlu0 }
 0x1c9   : > { %v985_v50 = vperm.slane %v2315_v61, %v2343_v22 }
 0x1ca   : > { %v319_v60 = vpop.trf.xlu1  ;;  %v2380_v62 = vsel %vm526_vm0, %v698_v43, %v649_v38 }
 0x1cb   : > { %v763_v1 = vsel %vm526_vm0, %v762_v54, %v319_v60  ;;  %v764_v47 = vrot.slane %v319_v60, 4 }
 0x1cc   : > { %v769_v5 = vperm.slane %v763_v1, %v2343_v22 }
 0x1cd   : > { %v765_v6 = vsel %vm526_vm0, %v383_v51, %v764_v47  ;;  %v1036_v47 = vrot.slane %v985_v50, 4 }
 0x1ce   : > { %v773_v7 = vperm.slane %v765_v6, %v2343_v22  ;;  %v798_v9 = vrot.slane %v769_v5, 4  ;;  %v2389_v12 = vsel %vm526_vm0, %v769_v5, %v800_v3  ;;  %v1093_v6 = vperm.slane %v2320_v2, %v2343_v22 }
 0x1cf   : > { %v384_v14 = vpop.trf.xlu2 }
 0x1d0   : > { %v810_v49 = vrot.slane %v773_v7, 4  ;;  %v874_v17 = vrot.slane %v384_v14, 4  ;;  %v2394_v18 = vsel %vm526_vm0, %v798_v9, %v757_v52  ;;  %v2397_v24 = vsel %vm526_vm0, %v773_v7, %v812_v13  ;;  %v2429_v1 = vpop.trf.xlu0 }
 0x1d1   : > { %v1136_v2 = vrot.slane %v1093_v6, 4 }
 0x1d2   : > { %v320_v26 = vpop.trf.xlu1  ;;  %v2402_v27 = vsel %vm526_vm0, %v810_v49, %v761_v63 }
 0x1d3   : > { %v875_v28 = vsel %vm526_vm0, %v874_v17, %v320_v26  ;;  %v876_v29 = vrot.slane %v320_v26, 4 }
 0x1d4   : > { %v881_v32 = vperm.slane %v875_v28, %v2343_v22 }
 0x1d5   : > { %v877_v33 = vsel %vm526_vm0, %v384_v14, %v876_v29 }
 0x1d6   : > { %v885_v38 = vperm.slane %v877_v33, %v2343_v22  ;;  %v910_v39 = vrot.slane %v881_v32, 4  ;;  %v2411_v55 = vsel %vm526_vm0, %v881_v32, %v912_v53 }
 0x1d7   : > { %v385_v42 = vpop.trf.xlu2 }
 0x1d8   : > { %v922_v44 = vrot.slane %v885_v38, 4  ;;  %v986_v45 = vrot.slane %v385_v42, 4  ;;  %v2416_v41 = vsel %vm526_vm0, %v910_v39, %v869_v16  ;;  %v2419_v46 = vsel %vm526_vm0, %v885_v38, %v924_v36 }
 0x1da   : > { %v321_v51 = vpop.trf.xlu1  ;;  %v2424_v52 = vsel %vm526_vm0, %v922_v44, %v873_v25  ;;  %v1097_v25 = vperm.slane %v2323_v4, %v2343_v22  ;;  %v1205_v4 = vperm.slane %v2326_v8, %v2343_v22 }
 0x1db   : > { %v987_v43 = vsel %vm526_vm0, %v986_v45, %v321_v51  ;;  %v988_v54 = vrot.slane %v321_v51, 4 }
 0x1dc   : > { %v993_v60 = vperm.slane %v987_v43, %v2343_v22  ;;  %v1148_v38 = vrot.slane %v1097_v25, 4 }
 0x1dd   : > { %v989_v63 = vsel %vm526_vm0, %v385_v42, %v988_v54  ;;  %v538_v54 = vrot.slane %v2341_v21, 4 }
 0x1de   : > { %v997_v3 = vperm.slane %v989_v63, %v2343_v22  ;;  %v1022_v5 = vrot.slane %v993_v60, 4  ;;  %v2433_v61 = vsel %vm526_vm0, %v993_v60, %v1024_v59  ;;  %v1248_v63 = vrot.slane %v1205_v4, 4 }
 0x1df   : > { %v386_v7 = vpop.trf.xlu2 }
 0x1e0   : > { %v1034_v9 = vrot.slane %v997_v3, 4  ;;  %v1098_v13 = vrot.slane %v386_v7, 4  ;;  %v2438_v14 = vsel %vm526_vm0, %v1022_v5, %v981_v40  ;;  %v2441_v16 = vsel %vm526_vm0, %v997_v3, %v1036_v47  ;;  %v2455_v40 = vpop.trf.xlu0 }
 0x1e2   : > { %v322_v49 = vpop.trf.xlu1  ;;  %v2444_v17 = vsel %vm526_vm0, %v1034_v9, %v985_v50 }
 0x1e3   : > { %v1099_v26 = vsel %vm526_vm0, %v1098_v13, %v322_v49  ;;  %v1100_v28 = vrot.slane %v322_v49, 4 }
 0x1e4   : > { %v1105_v29 = vperm.slane %v1099_v26, %v2343_v22 }
 0x1e5   : > { %v1101_v53 = vsel %vm526_vm0, %v386_v7, %v1100_v28 }
 0x1e6   : > { %v1109_v32 = vperm.slane %v1101_v53, %v2343_v22  ;;  %v1134_v33 = vrot.slane %v1105_v29, 4  ;;  %v2453_v36 = vsel %vm526_vm0, %v1105_v29, %v1136_v2 }
 0x1e7   : > { %v387_v39 = vpop.trf.xlu2 }
 0x1e8   : > { %v1146_v42 = vrot.slane %v1109_v32, 4  ;;  %v1210_v44 = vrot.slane %v387_v39, 4  ;;  %v2460_v45 = vsel %vm526_vm0, %v1134_v33, %v1093_v6  ;;  %v2463_v50 = vsel %vm526_vm0, %v1109_v32, %v1148_v38  ;;  %v445_v13 = vpop.trf.xlu0 }
 0x1e9   : > { %v539_v6 = vsel %vm526_vm0, %v538_v54, %v2345_v23  ;;  %v564_v2 = vrot.slane %v445_v13, 4  ;;  %v533_v23 = vperm.slane %v2294_v35, %v2343_v22  ;;  %v2135_v32 = vmov 1934713408  }
 0x1ea   : > { %v323_v51 = vpop.trf.xlu1  ;;  %v2466_v43 = vsel %vm526_vm0, %v1146_v42, %v1097_v25  ;;  %v545_v49 = vperm.slane %v539_v6, %v2343_v22  ;;  %v579_v33 = vunpack.c.l.s4 %v2135_v32  ;;  %v552_v42 = vrot.slane %v2317_v0, 4 }
 0x1eb   : > { %v1211_v59 = vsel %vm526_vm0, %v1210_v44, %v323_v51  ;;  %v1212_v60 = vrot.slane %v323_v51, 4  ;;  %v576_v51 = vrot.slane %v533_v23, 4 }
 0x1ec   : > { %v1217_v8 = vperm.slane %v1211_v59, %v2343_v22  ;;  %v574_v53 = vrot.slane %v545_v49, 4 }
 0x1ed   : > { %v2472_v47 = vsel %vm526_vm0, %v387_v39, %v1212_v60 }
 0x1ee   : > { %v1246_v3 = vrot.slane %v1217_v8, 4  ;;  %v2475_v5 = vsel %vm526_vm0, %v1217_v8, %v1248_v63  ;;  %v575_v60 = vsel %vm526_vm0, %v574_v53, %v533_v23  ;;  %v2496_v63 = vunpack.c.0.s8 %v579_v33 }
 0x1ef   : > { %v388_v7 = vpop.trf.xlu2 }
 0x1f0   : > { %v1322_v9 = vrot.slane %v388_v7, 4  ;;  %v2480_v21 = vsel %vm526_vm0, %v1246_v3, %v1205_v4 }
 0x1f2   : > { %v324_v25 = vpop.trf.xlu1 }
 0x1f3   : > { %v2484_v26 = vsel %vm526_vm0, %v1322_v9, %v324_v25  ;;  %v1324_v28 = vrot.slane %v324_v25, 4  ;;  %v593_v25 = vperm.slane %v2359_v37, %v2496_v63 }
 0x1f5   : > { %v2487_v29 = vsel %vm526_vm0, %v388_v7, %v1324_v28  ;;  %v577_v7 = vsel %vm526_vm0, %v545_v49, %v576_v51  ;;  %v446_v51 = vpop.trf.xlu0 }
 0x1f6   : > { %v585_v49 = vperm.slane %v577_v7, %v2496_v63 }
 0x1f7   : > { %v509_v38 = vpop.trf.xlu2 }
 0x1f8   : > { %v562_v39 = vrot.slane %v509_v38, 4  ;;  %v565_v4 = vsel %vm526_vm0, %v509_v38, %v564_v2  ;;  %v2507_v2 = vperm.slane %v575_v60, %v2496_v63 }
 0x1f9   : > { %v573_v44 = vperm.slane %v565_v4, %v2343_v22 }
 0x1fa   : > { %v563_v54 = vsel %vm526_vm0, %v562_v39, %v445_v13  ;;  %v477_v59 = vpop.trf.xlu1 }
 0x1fb   : > { %v569_v35 = vperm.slane %v563_v54, %v2343_v22  ;;  %v610_v8 = vrot.slane %v573_v44, 4  ;;  %v550_v3 = vrot.slane %v477_v59, 4  ;;  %v553_v6 = vsel %vm526_vm0, %v477_v59, %v552_v42 }
 0x1fc   : > { %v561_v9 = vperm.slane %v553_v6, %v2343_v22  ;;  %v632_v42 = vrot.slane %v593_v25, 4  ;;  %v624_v54 = vrot.slane %v2507_v2, 4 }
 0x1fd   : > { %v598_v28 = vrot.slane %v569_v35, 4  ;;  %v551_v13 = vsel %vm526_vm0, %v550_v3, %v2317_v0 }
 0x1fe   : > { %v557_v23 = vperm.slane %v551_v13, %v2343_v22  ;;  %v611_v53 = vsel %vm526_vm0, %v610_v8, %v561_v9  ;;  %v612_v32 = vrot.slane %v561_v9, 4 }
 0x1ff   : > { %v510_v33 = vpop.trf.xlu2  ;;  %v617_v38 = vperm.slane %v611_v53, %v2496_v63  ;;  %v676_v53 = vrot.slane %v446_v51, 4 }
 0x200   : > { %v600_v39 = vrot.slane %v557_v23, 4  ;;  %v674_v4 = vrot.slane %v510_v33, 4  ;;  %v599_v37 = vsel %vm526_vm0, %v598_v28, %v557_v23  ;;  %v613_v59 = vsel %vm526_vm0, %v573_v44, %v612_v32 }
 0x201   : > { %v2515_v0 = vperm.slane %v599_v37, %v2496_v63  ;;  %v630_v60 = vrot.slane %v617_v38, 4  ;;  %v621_v7 = vperm.slane %v613_v59, %v2496_v63  ;;  %v2523_v9 = vsel %vm526_vm0, %v617_v38, %v632_v42 }
 0x202   : > { %v675_v8 = vsel %vm526_vm0, %v674_v4, %v446_v51  ;;  %v478_v3 = vpop.trf.xlu1  ;;  %v601_v6 = vsel %vm526_vm0, %v569_v35, %v600_v39  ;;  %v628_v23 = vrot.slane %v585_v49, 4  ;;  %v597_v32 = vperm.slane %v2356_v34, %v2496_v63 }
 0x203   : > { %v681_v28 = vperm.slane %v675_v8, %v2343_v22  ;;  %v662_v13 = vrot.slane %v478_v3, 4  ;;  %v625_v37 = vsel %vm526_vm0, %v2515_v0, %v624_v54  ;;  %v609_v44 = vperm.slane %v601_v6, %v2496_v63 }
 0x204   : > { %1423 = vrot.lane.b32.xlu0 %v625_v37, %s2136_s17  ;;  %v634_v38 = vrot.slane %v621_v7, 4  ;;  %v631_v39 = vsel %vm526_vm0, %v630_v60, %v593_v25  ;;  %v664_v42 = vrot.slane %v2328_v10, 4  ;;  %v677_v8 = vsel %vm526_vm0, %v510_v33, %v676_v53 }
 0x205   : > { %v710_v4 = vrot.slane %v681_v28, 4  ;;  %v663_v35 = vsel %vm526_vm0, %v662_v13, %v2328_v10  ;;  %v629_v54 = vsel %vm526_vm0, %v609_v44, %v628_v23  ;;  %v626_v34 = vrot.slane %v609_v44, 4 }
 0x206   : > { %v669_v51 = vperm.slane %v663_v35, %v2343_v22  ;;  %1431 = vrot.lane.b32.xlu2 %v629_v54, %s2137_s21  ;;  %v635_v59 = vsel %vm526_vm0, %v634_v38, %v597_v32  ;;  %v665_v6 = vsel %vm526_vm0, %v478_v3, %v664_v42  ;;  %v636_v37 = vrot.slane %v597_v32, 4 }
 0x207   : > { %v627_v25 = vsel %vm526_vm0, %v626_v34, %v585_v49  ;;  %v685_v23 = vperm.slane %v677_v8, %v2343_v22  ;;  %v673_v44 = vperm.slane %v665_v6, %v2343_v22  ;;  %v693_v3 = vperm.slane %v2372_v56, %v2496_v63  ;;  %v511_v32 = vpop.trf.xlu2  ;;  %v447_v56 = vpop.trf.xlu0 }
 0x208   : > { %v711_v13 = vsel %vm526_vm0, %v710_v4, %v669_v51  ;;  %1427 = vrot.lane.b32.xlu1 %v627_v25, %s2138_s26  ;;  %v2547_v60 = vsel %vm526_vm0, %v621_v7, %v636_v37  ;;  %v712_v33 = vrot.slane %v669_v51, 4  ;;  %v2558_v7 = vperm.slane %v2367_v48, %v2496_v63 }
 0x209   : > { %v717_v10 = vperm.slane %v711_v13, %v2496_v63  ;;  %v722_v4 = vrot.slane %v685_v23, 4  ;;  %v724_v35 = vrot.slane %v673_v44, 4  ;;  %v786_v42 = vrot.slane %v511_v32, 4 }
 0x20a   : > { %v713_v38 = vsel %vm526_vm0, %v681_v28, %v712_v33  ;;  %v479_v51 = vpop.trf.xlu1  ;;  %v788_v6 = vrot.slane %v447_v56, 4  ;;  %v736_v28 = vrot.slane %v693_v3, 4 }
 0x20b   : > { %v734_v53 = vrot.slane %v717_v10, 4  ;;  %v2563_v54 = vperm.slane %v713_v38, %v2496_v63  ;;  %v723_v34 = vsel %vm526_vm0, %v722_v4, %v673_v44  ;;  %v725_v8 = vsel %vm526_vm0, %v685_v23, %v724_v35 }
 0x20c   : > { %v787_v48 = vsel %vm526_vm0, %v786_v42, %v447_v56  ;;  %v774_v13 = vrot.slane %v479_v51, 4  ;;  %v737_v37 = vsel %vm526_vm0, %v717_v10, %v736_v28  ;;  %v733_v33 = vperm.slane %v725_v8, %v2496_v63 }
 0x20d   : > { %v735_v49 = vsel %vm526_vm0, %v734_v53, %v693_v3  ;;  %v793_v44 = vperm.slane %v787_v48, %v2343_v22  ;;  %v789_v23 = vsel %vm526_vm0, %v511_v32, %v788_v6  ;;  %v776_v3 = vrot.slane %v2339_v20, 4 }
 0x20e   : > { %1443 = vrot.lane.b32.xlu2 %v635_v59, %s2139_s2  ;;  %1451 = vrot.lane.b32.xlu0 %v735_v49, %s2140_s3  ;;  %v740_v59 = vrot.slane %v2558_v7, 4  ;;  %v775_v10 = vsel %vm526_vm0, %v774_v13, %v2339_v20  ;;  %v746_v49 = vrot.slane %v733_v33, 4  ;;  %v797_v4 = vperm.slane %v789_v23, %v2343_v22 }
 0x20f   : > { %v822_v35 = vrot.slane %v793_v44, 4  ;;  %v781_v38 = vperm.slane %v775_v10, %v2343_v22  ;;  %v777_v42 = vsel %vm526_vm0, %v479_v51, %v776_v3  ;;  %v2591_v32 = vperm.slane %v2380_v62, %v2496_v63  ;;  %v512_v51 = vpop.trf.xlu2 }
 0x210   : > { %1435 = vrot.lane.b32.xlu1 %v631_v39, %s2141_s4  ;;  %v741_v25 = vsel %vm526_vm0, %v2563_v54, %v740_v59  ;;  %v2573_v39 = vperm.slane %v723_v34, %v2496_v63  ;;  %v709_v20 = vperm.slane %v2377_v58, %v2496_v63  ;;  %v834_v34 = vrot.slane %v797_v4, 4 }
 0x211   : > { %v785_v59 = vperm.slane %v777_v42, %v2343_v22  ;;  %v824_v8 = vrot.slane %v781_v38, 4  ;;  %v823_v62 = vsel %vm526_vm0, %v822_v35, %v781_v38  ;;  %v2604_v58 = vperm.slane %v2394_v18, %v2496_v63  ;;  %v448_v35 = vpop.trf.xlu0 }
 0x212   : > { %v742_v53 = vrot.slane %v2573_v39, 4  ;;  %v747_v56 = vsel %vm526_vm0, %v746_v49, %v709_v20  ;;  %v2606_v6 = vpop.trf.xlu1  ;;  %v2611_v48 = vperm.slane %v823_v62, %v2496_v63  ;;  %v748_v23 = vrot.slane %v709_v20, 4 }
 0x213   : > { %v835_v13 = vsel %vm526_vm0, %v834_v34, %v785_v59  ;;  %v825_v28 = vsel %vm526_vm0, %v793_v44, %v824_v8  ;;  %v848_v18 = vrot.slane %v2604_v58, 4  ;;  %v738_v10 = vrot.slane %v2563_v54, 4 }
 0x214   : > { %v749_v3 = vsel %vm526_vm0, %v733_v33, %v748_v23  ;;  %v841_v49 = vperm.slane %v835_v13, %v2496_v63  ;;  %v836_v20 = vrot.slane %v785_v59, 4  ;;  %v2638_v34 = vperm.slane %v2389_v12, %v2496_v63 }
 0x215   : > { %v739_v33 = vsel %vm526_vm0, %v738_v10, %v2558_v7  ;;  %v817_v8 = vperm.slane %v2402_v27, %v2496_v63  ;;  %v1221_v7 = vperm.slane %v2472_v47, %v2343_v22  ;;  %v1209_v62 = vperm.slane %v2331_v11, %v2343_v22 }
 0x216   : > { %1455 = vrot.lane.b32.xlu2 %v737_v37, %s3173_s5  ;;  %1463 = vrot.lane.b32.xlu0 %v741_v25, %s2143_s14  ;;  %v898_v37 = vrot.slane %v512_v51, 4  ;;  %v886_v25 = vrot.slane %v2606_v6, 4  ;;  %v854_v42 = vrot.slane %v841_v49, 4  ;;  %v744_v12 = vrot.slane %v2591_v32, 4  ;;  %s2162_s5 = smov 88  }
 0x217   : > { %v837_v27 = vsel %vm526_vm0, %v797_v4, %v836_v20  ;;  %v900_v47 = vrot.slane %v448_v35, 4  ;;  %v2655_v11 = vperm.slane %v2397_v24, %v2496_v63  ;;  %v1329_v23 = vperm.slane %v2484_v26, %v2343_v22 }
 0x218   : > { %1439 = vrot.lane.b32.xlu1 %v2523_v9, %s2144_s15  ;;  %v743_v9 = vsel %vm526_vm0, %v742_v53, %v2591_v32  ;;  %v2622_v53 = vperm.slane %v825_v28, %v2496_v63  ;;  %v899_v44 = vsel %vm526_vm0, %v898_v37, %v448_v35  ;;  %v887_v54 = vsel %vm526_vm0, %v886_v25, %v2352_v30 }
 0x219   : > { %v855_v13 = vsel %vm526_vm0, %v854_v42, %v817_v8  ;;  %v1258_v25 = vrot.slane %v1221_v7, 4  ;;  %v745_v10 = vsel %vm526_vm0, %v2573_v39, %v744_v12  ;;  %v2665_v4 = vperm.slane %v837_v27, %v2496_v63 }
 0x21a   : > { %v850_v38 = vrot.slane %v2622_v53, 4  ;;  %v1317_v24 = vperm.slane %v2334_v15, %v2343_v22  ;;  %v888_v32 = vrot.slane %v2352_v30, 4  ;;  %v901_v39 = vsel %vm526_vm0, %v512_v51, %v900_v47 }
 0x21b   : > { %v856_v35 = vrot.slane %v817_v8, 4  ;;  %v846_v42 = vrot.slane %v2611_v48, 4  ;;  %v2678_v15 = vsel %vm526_vm0, %v1258_v25, %v1209_v62 }
 0x21c   : > { %v851_v59 = vsel %vm526_vm0, %v850_v38, %v2638_v34  ;;  %v513_v38 = vpop.trf.xlu2 }
 0x21d   : > { %v857_v30 = vsel %vm526_vm0, %v841_v49, %v856_v35  ;;  %v889_v49 = vsel %vm526_vm0, %v2606_v6, %v888_v32  ;;  %v1010_v8 = vrot.slane %v513_v38, 4  ;;  %v2717_v32 = vperm.slane %v2416_v41, %v2496_v63 }
 0x21e   : > { %1467 = vrot.lane.b32.xlu2 %v743_v9, %s3166_s19  ;;  %1475 = vrot.lane.b32.xlu0 %v747_v56, %s2146_s23  ;;  %v905_v9 = vperm.slane %v899_v44, %v2343_v22  ;;  %v893_v56 = vperm.slane %v887_v54, %v2343_v22  ;;  %v860_v44 = vrot.slane %v2655_v11, 4  ;;  %v1358_v54 = vrot.slane %v1329_v23, 4  ;;  %s3168_s19 = smov 92  }
 0x21f   : > { %v897_v25 = vperm.slane %v889_v49, %v2343_v22 }
 0x220   : > { %1447 = vrot.lane.b32.xlu1 %v2547_v60, %s2147_s18  ;;  %v849_v60 = vsel %vm526_vm0, %v2611_v48, %v848_v18  ;;  %v934_v28 = vrot.slane %v905_v9, 4  ;;  %v936_v37 = vrot.slane %v893_v56, 4  ;;  %v1333_v18 = vperm.slane %v2487_v29, %v2343_v22 }
 0x221   : > { %v1321_v29 = vperm.slane %v2337_v19, %v2343_v22  ;;  %v861_v20 = vsel %vm526_vm0, %v2665_v4, %v860_v44  ;;  %v2732_v44 = vperm.slane %v2424_v52, %v2496_v63 }
 0x222   : > { %v937_v26 = vsel %vm526_vm0, %v905_v9, %v936_v37  ;;  %v1360_v9 = vrot.slane %v1317_v24, 4  ;;  %v2698_v37 = vsel %vm526_vm0, %v1358_v54, %v1317_v24 }
 0x223   : > { %v945_v19 = vperm.slane %v937_v26, %v2496_v63 }
 0x224   : > { %v2701_v12 = vsel %vm526_vm0, %v1329_v23, %v1360_v9 }
 0x226   : > { %1479 = vrot.lane.b32.xlu2 %v749_v3, %s3163_s24  ;;  %1487 = vrot.lane.b32.xlu0 %v849_v60, %s3169_s29  ;;  %s3165_s24 = smov 80   ;;  %v1260_v3 = vrot.slane %v1209_v62, 4  ;;  %v935_v60 = vsel %vm526_vm0, %v934_v28, %v893_v56  ;;  %v909_v56 = vperm.slane %v901_v39, %v2343_v22  ;;  %v1372_v62 = vrot.slane %v1321_v29, 4  ;;  %s3171_s29 = smov 96  }
 0x227   : > { %v2685_v51 = vperm.slane %v935_v60, %v2496_v63  ;;  %v847_v28 = vsel %vm526_vm0, %v846_v42, %v2604_v58  ;;  %v921_v58 = vperm.slane %v2411_v55, %v2496_v63  ;;  %v852_v55 = vrot.slane %v2638_v34, 4 }
 0x228   : > { %1459 = vrot.lane.b32.xlu1 %v739_v33, %s2150_s20  ;;  %v1370_v33 = vrot.slane %v1333_v18, 4  ;;  %v2691_v48 = vsel %vm526_vm0, %v1221_v7, %v1260_v3  ;;  %v962_v7 = vrot.slane %v945_v19, 4  ;;  %v946_v47 = vrot.slane %v909_v56, 4 }
 0x229   : > { %v958_v27 = vrot.slane %v2685_v51, 4  ;;  %v853_v54 = vsel %vm526_vm0, %v2622_v53, %v852_v55  ;;  %v968_v53 = vrot.slane %v2732_v44, 4  ;;  %v964_v9 = vrot.slane %v921_v58, 4 }
 0x22a   : > { %v2706_v6 = vsel %vm526_vm0, %v1370_v33, %v1321_v29  ;;  %v963_v26 = vsel %vm526_vm0, %v962_v7, %v921_v58  ;;  %v948_v29 = vrot.slane %v897_v25, 4  ;;  %v1000_v33 = vrot.slane %v2374_v57, 4 }
 0x22b   : > { %v959_v60 = vsel %vm526_vm0, %v958_v27, %v2717_v32 }
 0x22c   : > { %v949_v52 = vsel %vm526_vm0, %v909_v56, %v948_v29 }
 0x22e   : > { %1491 = vrot.lane.b32.xlu2 %v851_v59, %s3164_s30  ;;  %1499 = vrot.lane.b32.xlu0 %v855_v13, %s3165_s24  ;;  %s2153_s30 = smov 52   ;;  %s3167_s24 = smov 84   ;;  %v449_v59 = vpop.trf.xlu0  ;;  %v481_v13 = vpop.trf.xlu1 }
 0x22f   : > { %v1012_v23 = vrot.slane %v449_v59, 4  ;;  %v1011_v3 = vsel %vm526_vm0, %v1010_v8, %v449_v59  ;;  %v998_v24 = vrot.slane %v481_v13, 4  ;;  %v965_v8 = vsel %vm526_vm0, %v945_v19, %v964_v9  ;;  %v514_v19 = vpop.trf.xlu2 }
 0x230   : > { %1471 = vrot.lane.b32.xlu1 %v745_v10, %s2153_s30  ;;  %v2712_v10 = vsel %vm526_vm0, %v1333_v18, %v1372_v62  ;;  %v1017_v39 = vperm.slane %v1011_v3, %v2343_v22  ;;  %v947_v18 = vsel %vm526_vm0, %v946_v47, %v897_v25  ;;  %v2753_v62 = vperm.slane %v949_v52, %v2496_v63 }
 0x231   : > { %v1013_v41 = vsel %vm526_vm0, %v513_v38, %v1012_v23  ;;  %v999_v35 = vsel %vm526_vm0, %v998_v24, %v2374_v57  ;;  %v2739_v34 = vperm.slane %v947_v18, %v2496_v63  ;;  %v858_v57 = vrot.slane %v2665_v4, 4 }
 0x232   : > { %v2742_v38 = vperm.slane %v1013_v41, %v2343_v22  ;;  %v1046_v42 = vrot.slane %v1017_v39, 4  ;;  %v970_v47 = vrot.slane %v2753_v62, 4  ;;  %v933_v24 = vperm.slane %v2419_v46, %v2496_v63 }
 0x233   : > { %v969_v49 = vsel %vm526_vm0, %v2739_v34, %v968_v53  ;;  %v859_v27 = vsel %vm526_vm0, %v858_v57, %v2655_v11  ;;  %v960_v46 = vrot.slane %v2717_v32, 4  ;;  %v1041_v53 = vperm.slane %v2444_v17, %v2496_v63 }
 0x234   : > { %v1058_v59 = vrot.slane %v2742_v38, 4 }
 0x236   : > { %1503 = vrot.lane.b32.xlu2 %v857_v30, %s3167_s24  ;;  %1511 = vrot.lane.b32.xlu0 %v861_v20, %s3168_s19  ;;  %s2156_s24 = smov 64   ;;  %s3170_s19 = smov 104   ;;  %v1005_v30 = vperm.slane %v999_v35, %v2343_v22  ;;  %v1001_v20 = vsel %vm526_vm0, %v481_v13, %v1000_v33  ;;  %v2762_v13 = vperm.slane %v2438_v14, %v2496_v63  ;;  %v2764_v7 = vpop.trf.xlu1  ;;  %v1122_v14 = vrot.slane %v514_v19, 4  ;;  %v450_v18 = vpop.trf.xlu0 }
 0x237   : > { %v1110_v3 = vrot.slane %v2764_v7, 4  ;;  %v961_v35 = vsel %vm526_vm0, %v2685_v51, %v960_v46  ;;  %v2798_v32 = vpop.trf.xlu2  ;;  %v966_v51 = vrot.slane %v2739_v34, 4 }
 0x238   : > { %1483 = vrot.lane.b32.xlu1 %v847_v28, %s2156_s24  ;;  %v1009_v28 = vperm.slane %v1001_v20, %v2343_v22  ;;  %v1048_v56 = vrot.slane %v1005_v30, 4  ;;  %v1047_v4 = vsel %vm526_vm0, %v1046_v42, %v1005_v30  ;;  %v1072_v11 = vrot.slane %v2762_v13, 4 }
 0x239   : > { %v2771_v25 = vperm.slane %v1047_v4, %v2496_v63  ;;  %v1111_v41 = vsel %vm526_vm0, %v1110_v3, %v2405_v31  ;;  %v1033_v20 = vperm.slane %v2433_v61, %v2496_v63  ;;  %v2813_v61 = vperm.slane %v2441_v16, %v2496_v63 }
 0x23a   : > { %v1059_v58 = vsel %vm526_vm0, %v1058_v59, %v1009_v28  ;;  %v1049_v23 = vsel %vm526_vm0, %v1017_v39, %v1048_v56  ;;  %v1123_v39 = vsel %vm526_vm0, %v1122_v14, %v450_v18  ;;  %v1060_v42 = vrot.slane %v1009_v28, 4 }
 0x23b   : > { %v2783_v29 = vperm.slane %v1049_v23, %v2496_v63  ;;  %v1065_v55 = vperm.slane %v1059_v58, %v2496_v63  ;;  %v1129_v30 = vperm.slane %v1123_v39, %v2343_v22  ;;  %v1117_v52 = vperm.slane %v1111_v41, %v2343_v22 }
 0x23c   : > { %v1061_v59 = vsel %vm526_vm0, %v2742_v38, %v1060_v42  ;;  %v1124_v28 = vrot.slane %v450_v18, 4  ;;  %v967_v17 = vsel %vm526_vm0, %v966_v51, %v2732_v44  ;;  %v1084_v16 = vrot.slane %v2813_v61, 4 }
 0x23d   : > { %v1078_v33 = vrot.slane %v1065_v55, 4  ;;  %v2819_v34 = vperm.slane %v1061_v59, %v2496_v63  ;;  %v1112_v58 = vrot.slane %v2405_v31, 4  ;;  %v972_v31 = vrot.slane %v933_v24, 4 }
 0x23e   : > { %1523 = vrot.lane.b32.xlu0 %v963_v26, %s3170_s19  ;;  %1515 = vrot.lane.b32.xlu2 %v959_v60, %s3171_s29  ;;  %s3172_s19 = smov 76   ;;  %s3175_s29 = smov 116   ;;  %v971_v26 = vsel %vm526_vm0, %v970_v47, %v933_v24  ;;  %v1073_v60 = vsel %vm526_vm0, %v2771_v25, %v1072_v11  ;;  %v1125_v38 = vsel %vm526_vm0, %v514_v19, %v1124_v28  ;;  %v1080_v47 = vrot.slane %v1041_v53, 4  ;;  %v483_v44 = vpop.trf.xlu1 }
 0x23f   : > { %v1079_v57 = vsel %vm526_vm0, %v1078_v33, %v1041_v53  ;;  %v2827_v23 = vpop.trf.xlu2  ;;  %v1085_v3 = vsel %vm526_vm0, %v2819_v34, %v1084_v16  ;;  %v1133_v19 = vperm.slane %v1125_v38, %v2343_v22  ;;  %v1113_v18 = vsel %vm526_vm0, %v2764_v7, %v1112_v58 }
 0x240   : > { %1495 = vrot.lane.b32.xlu1 %v853_v54, %s3172_s19  ;;  %s3174_s19 = smov 108   ;;  %v1074_v54 = vrot.slane %v2783_v29, 4  ;;  %v1081_v14 = vsel %vm526_vm0, %v1065_v55, %v1080_v47  ;;  %v1222_v46 = vrot.slane %v483_v44, 4  ;;  %v973_v39 = vsel %vm526_vm0, %v2753_v62, %v972_v31 }
 0x241   : > { %v1121_v33 = vperm.slane %v1113_v18, %v2343_v22  ;;  %v1145_v42 = vperm.slane %v2453_v36, %v2496_v63  ;;  %v1141_v62 = vperm.slane %v2460_v45, %v2496_v63  ;;  %v1076_v51 = vrot.slane %v1033_v20, 4 }
 0x242   : > { %v1075_v9 = vsel %vm526_vm0, %v1074_v54, %v1033_v20  ;;  %v1170_v54 = vrot.slane %v1133_v19, 4  ;;  %v1223_v7 = vsel %vm526_vm0, %v1222_v46, %v2429_v1  ;;  %v2864_v45 = vperm.slane %v2466_v43, %v2496_v63 }
 0x243   : > { %v1224_v38 = vrot.slane %v2429_v1, 4  ;;  %v1082_v43 = vrot.slane %v2819_v34, 4 }
 0x244   : > { %v1171_v36 = vsel %vm526_vm0, %v1170_v54, %v1121_v33 }
 0x245   : > { %v2870_v20 = vperm.slane %v1171_v36, %v2496_v63  ;;  %v1225_v34 = vsel %vm526_vm0, %v483_v44, %v1224_v38  ;;  %v1253_v44 = vperm.slane %v2480_v21, %v2496_v63 }
 0x246   : > { %1535 = vrot.lane.b32.xlu0 %v969_v49, %s3175_s29  ;;  %1527 = vrot.lane.b32.xlu2 %v965_v8, %s3174_s19  ;;  %s2163_s19 = smov 120   ;;  %s2164_s29 = smov 100   ;;  %v1158_v49 = vrot.slane %v1129_v30, 4  ;;  %v1160_v8 = vrot.slane %v1117_v52, 4  ;;  %v1233_v31 = vperm.slane %v1225_v34, %v2343_v22 }
 0x248   : > { %1507 = vrot.lane.b32.xlu1 %v859_v27, %s2162_s5  ;;  %v1161_v56 = vsel %vm526_vm0, %v1129_v30, %v1160_v8  ;;  %v1159_v4 = vsel %vm526_vm0, %v1158_v49, %v1117_v52  ;;  %v1234_v27 = vrot.slane %v2798_v32, 4  ;;  %v1229_v49 = vperm.slane %v1223_v7, %v2343_v22 }
 0x249   : > { %v1169_v11 = vperm.slane %v1161_v56, %v2496_v63  ;;  %v1077_v8 = vsel %vm526_vm0, %v2783_v29, %v1076_v51  ;;  %v1192_v56 = vrot.slane %v2864_v45, 4 }
 0x24a   : > { %v1272_v18 = vrot.slane %v1229_v49, 4 }
 0x24b   : > { %v1186_v41 = vrot.slane %v1169_v11, 4  ;;  %v1193_v29 = vsel %vm526_vm0, %v2870_v20, %v1192_v56 }
 0x24d   : > { %v1187_v52 = vsel %vm526_vm0, %v1186_v41, %v1145_v42  ;;  %v1284_v41 = vrot.slane %v1233_v31, 4 }
 0x24e   : > { %1539 = vrot.lane.b32.xlu2 %v971_v26, %s2163_s19  ;;  %1547 = vrot.lane.b32.xlu0 %v1073_v60, %s2136_s17  ;;  %s2165_s17 = smov 112   ;;  %v2834_v26 = vperm.slane %v1159_v4, %v2496_v63  ;;  %v451_v60 = vpop.trf.xlu0  ;;  %v1188_v4 = vrot.slane %v1145_v42, 4 }
 0x24f   : > { %v1235_v55 = vsel %vm526_vm0, %v1234_v27, %v451_v60 }
 0x250   : > { %1519 = vrot.lane.b32.xlu1 %v961_v35, %s2164_s29  ;;  %v1182_v35 = vrot.slane %v2834_v26, 4  ;;  %v1241_v24 = vperm.slane %v1235_v55, %v2343_v22  ;;  %v1189_v27 = vsel %vm526_vm0, %v1169_v11, %v1188_v4  ;;  %v484_v55 = vpop.trf.xlu1 }
 0x251   : > { %v1334_v51 = vrot.slane %v484_v55, 4 }
 0x252   : > { %v1183_v53 = vsel %vm526_vm0, %v1182_v35, %v1141_v62  ;;  %v1184_v35 = vrot.slane %v1141_v62, 4  ;;  %v1273_v54 = vsel %vm526_vm0, %v1241_v24, %v1272_v18 }
 0x254   : > { %v1185_v42 = vsel %vm526_vm0, %v2834_v26, %v1184_v35  ;;  %v1190_v26 = vrot.slane %v2870_v20, 4  ;;  %v1335_v20 = vsel %vm526_vm0, %v1334_v51, %v2455_v40 }
 0x256   : > { %1551 = vrot.lane.b32.xlu2 %v1075_v9, %s2138_s26  ;;  %1559 = vrot.lane.b32.xlu0 %v1079_v57, %s2141_s4  ;;  %s2166_s26 = smov 124   ;;  %v1172_v9 = vrot.slane %v1121_v33, 4  ;;  %v1270_v57 = vrot.slane %v1241_v24, 4  ;;  %v1346_v33 = vrot.slane %v2827_v23, 4  ;;  %v1191_v4 = vsel %vm526_vm0, %v1190_v26, %v2864_v45  ;;  %s3200_s4 = smov 48  }
 0x258   : > { %1531 = vrot.lane.b32.xlu1 %v967_v17, %s2165_s17  ;;  %v1173_v59 = vsel %vm526_vm0, %v1133_v19, %v1172_v9  ;;  %v1271_v28 = vsel %vm526_vm0, %v1270_v57, %v1229_v49  ;;  %v1236_v17 = vrot.slane %v451_v60, 4  ;;  %v1296_v57 = vrot.slane %v1253_v44, 4 }
 0x259   : > { %v2881_v47 = vperm.slane %v1173_v59, %v2496_v63  ;;  %v1277_v16 = vperm.slane %v1271_v28, %v2496_v63 }
 0x25a   : > { %v1237_v1 = vsel %vm526_vm0, %v2798_v32, %v1236_v17  ;;  %v1157_v32 = vperm.slane %v2463_v50, %v2496_v63  ;;  %v2909_v50 = vperm.slane %v2475_v5, %v2496_v63 }
 0x25b   : > { %v1194_v11 = vrot.slane %v2881_v47, 4  ;;  %v1294_v19 = vrot.slane %v1277_v16, 4  ;;  %v1245_v60 = vperm.slane %v1237_v1, %v2343_v22  ;;  %v1297_v36 = vsel %vm526_vm0, %v1277_v16, %v1296_v57 }
 0x25c   : > { %v1300_v49 = vrot.slane %v2909_v50, 4  ;;  %v1341_v1 = vperm.slane %v1335_v20, %v2343_v22 }
 0x25d   : > { %v1195_v46 = vsel %vm526_vm0, %v1194_v11, %v1157_v32 }
 0x25e   : > { %1563 = vrot.lane.b32.xlu2 %v1081_v14, %s2144_s15  ;;  %1571 = vrot.lane.b32.xlu0 %v1085_v3, %s2147_s18  ;;  %v452_v14 = vpop.trf.xlu0  ;;  %v1083_v3 = vsel %vm526_vm0, %v1082_v43, %v2813_v61  ;;  %v1295_v61 = vsel %vm526_vm0, %v1294_v19, %v1253_v44  ;;  %v1336_v43 = vrot.slane %v2455_v40, 4  ;;  %v1269_v40 = vperm.slane %v2691_v48, %v2496_v63  ;;  %s3202_s15 = smov 60   ;;  %s3205_s18 = smov 104  }
 0x25f   : > { %v1348_v62 = vrot.slane %v452_v14, 4  ;;  %v1347_v5 = vsel %vm526_vm0, %v1346_v33, %v452_v14  ;;  %v1384_v18 = vrot.slane %v1341_v1, 4 }
 0x260   : > { %1543 = vrot.lane.b32.xlu1 %v973_v39, %s2166_s26  ;;  %v2854_v30 = vpop.permute.xlu2 %1431  ;;  %v1282_v39 = vrot.slane %v1245_v60, 4  ;;  %v1353_v56 = vperm.slane %v1347_v5, %v2343_v22  ;;  %v1337_v14 = vsel %vm526_vm0, %v484_v55, %v1336_v43  ;;  %v1196_v55 = vrot.slane %v1157_v32, 4 }
 0x261   : > { %v1349_v17 = vsel %vm526_vm0, %v2827_v23, %v1348_v62 }
 0x262   : > { %v1283_v24 = vsel %vm526_vm0, %v1282_v39, %v1233_v31  ;;  %v1382_v16 = vrot.slane %v1353_v56, 4  ;;  %v1345_v31 = vperm.slane %v1337_v14, %v2343_v22  ;;  %v1197_v48 = vsel %vm526_vm0, %v2881_v47, %v1196_v55 }
 0x263   : > { %v2932_v59 = vperm.slane %v1283_v24, %v2496_v63  ;;  %v1385_v32 = vsel %vm526_vm0, %v1353_v56, %v1384_v18  ;;  %v1381_v56 = vperm.slane %v2712_v10, %v2496_v63 }
 0x264   : > { %v1383_v44 = vsel %vm526_vm0, %v1382_v16, %v1341_v1  ;;  %v2990_v24 = vperm.slane %v1385_v32, %v2496_v63  ;;  %v1396_v57 = vrot.slane %v1345_v31, 4 }
 0x265   : > { %v1302_v23 = vrot.slane %v2932_v59, 4  ;;  %v1420_v16 = vrot.slane %v1381_v56, 4 }
 0x266   : > { %1583 = vrot.lane.b32.xlu0 %v1187_v52, %s2150_s20  ;;  %1575 = vrot.lane.b32.xlu2 %v1183_v53, %s2140_s3  ;;  %v2919_v52 = vperm.slane %v1273_v54, %v2496_v63  ;;  %v1285_v53 = vsel %vm526_vm0, %v1245_v60, %v1284_v41  ;;  %s3199_s3 = smov 76   ;;  %v1308_v41 = vrot.slane %v1269_v40, 4  ;;  %v1410_v5 = vrot.slane %v2990_v24, 4  ;;  %s3208_s20 = smov 96  }
 0x267   : > { %v1293_v28 = vperm.slane %v1285_v53, %v2496_v63 }
 0x268   : > { %1555 = vrot.lane.b32.xlu1 %v1077_v8, %s2137_s21  ;;  %v2884_v58 = vpop.permute.xlu2 %1443  ;;  %s3197_s21 = smov 36   ;;  %v1301_v8 = vsel %vm526_vm0, %v2919_v52, %v1300_v49  ;;  %v1298_v47 = vrot.slane %v2919_v52, 4 }
 0x269   : > { %v1309_v33 = vsel %vm526_vm0, %v1293_v28, %v1308_v41 }
 0x26e   : > { %1595 = vrot.lane.b32.xlu0 %v1193_v29, %s2153_s30  ;;  %1587 = vrot.lane.b32.xlu2 %v1189_v27, %s2143_s14  ;;  %v2948_v29 = vperm.slane %v1349_v17, %v2343_v22  ;;  %v1306_v27 = vrot.slane %v1293_v28, 4  ;;  %s3201_s14 = smov 80   ;;  %v2977_v22 = vperm.slane %v1383_v44, %v2496_v63  ;;  %s3209_s30 = smov 108  }
 0x270   : > { %1567 = vrot.lane.b32.xlu1 %v1083_v3, %s2139_s2  ;;  %v2911_v21 = vpop.permute.xlu2 %1455  ;;  %s3198_s2 = smov 68   ;;  %v1265_v3 = vperm.slane %v2678_v15, %v2496_v63  ;;  %v1394_v11 = vrot.slane %v2948_v29, 4  ;;  %v1307_v60 = vsel %vm526_vm0, %v1306_v27, %v1269_v40  ;;  %v2969_v15 = vperm.slane %v2698_v37, %v2496_v63 }
 0x271   : > { %v622_v37 = vrot.slane %v2515_v0, 4  ;;  %v1299_v0 = vsel %vm526_vm0, %v1298_v47, %v2909_v50  ;;  %v1369_v50 = vperm.slane %v2701_v12, %v2496_v63  ;;  %v1397_v12 = vsel %vm526_vm0, %v2948_v29, %v1396_v57 }
 0x272   : > { %v1303_v19 = vsel %vm526_vm0, %v1302_v23, %v1265_v3  ;;  %v1408_v35 = vrot.slane %v2969_v15, 4  ;;  %v1405_v43 = vperm.slane %v1397_v12, %v2496_v63  ;;  %v1406_v1 = vrot.slane %v2977_v22, 4 }
 0x273   : > { %v623_v53 = vsel %vm526_vm0, %v622_v37, %v2507_v2  ;;  %v1377_v2 = vperm.slane %v2706_v6, %v2496_v63 }
 0x275   : > { %v1416_v27 = vrot.slane %v1377_v2, 4 }
 0x276   : > { %1599 = vrot.lane.b32.xlu2 %v1195_v46, %s2146_s23  ;;  %1607 = vrot.lane.b32.xlu0 %v1295_v61, %s2156_s24  ;;  %v2913_v7 = vpop.permute.xlu0 %1423  ;;  %v1395_v61 = vsel %vm526_vm0, %v1394_v11, %v1345_v31  ;;  %s3204_s23 = smov 72   ;;  %s3206_s24 = smov 84  }
 0x277   : > { %v1401_v62 = vperm.slane %v1395_v61, %v2496_v63  ;;  %v1671_v49 = vsel %vm1670_vm1, %v623_v53, %v2913_v7 }
 0x278   : > { %1579 = vrot.lane.b32.xlu1 %v1185_v42, %s3197_s21  ;;  %v2953_v34 = vpop.permute.xlu2 %1467  ;;  %v1409_v42 = vsel %vm526_vm0, %v2977_v22, %v1408_v35  ;;  %s1882_s21 = sshll.u32 %s2117_s10, 4 }
 0x279   : > { %v1414_v51 = vrot.slane %v1401_v62, 4  ;;  %v1417_v14 = vsel %vm526_vm0, %v1401_v62, %v1416_v27 }
 0x27a   : > { %v2924_v9 = vpop.permute.xlu1 %1427 }
 0x27b   : > { %v1673_v26 = vsel %vm1672_vm2, %v1671_v49, %v2924_v9  ;;  %v1415_v28 = vsel %vm526_vm0, %v1414_v51, %v1377_v2  ;;  %v1304_v9 = vrot.slane %v1265_v3, 4 }
 0x27c   : > { %v1675_v7 = vsel %vm1674_vm3, %v1673_v26, %v2854_v30 }
 0x27d   : > { %v1305_v30 = vsel %vm526_vm0, %v2932_v59, %v1304_v9  ;;  %v1421_v59 = vsel %vm526_vm0, %v1405_v43, %v1420_v16 }
 0x27e   : > { %1611 = vrot.lane.b32.xlu2 %v1297_v36, %s3198_s2  ;;  %1619 = vrot.lane.b32.xlu0 %v1301_v8, %s3199_s3  ;;  %v1411_v8 = vsel %vm526_vm0, %v1410_v5, %v1369_v50 }
 0x280   : > { %v2944_v38 = vpop.permute.xlu0 %1451  ;;  %1591 = vrot.lane.b32.xlu1 %v1191_v4, %s3200_s4  ;;  %v2983_v54 = vpop.permute.xlu2 %1479 }
 0x282   : > { %v1436_v45 = vpop.permute.xlu1 %1435 }
 0x283   : > { %v1677_v6 = vsel %vm1676_vm4, %v1675_v7, %v1436_v45  ;;  %v1407_v45 = vsel %vm526_vm0, %v1406_v1, %v2969_v15 }
 0x286   : > { %1623 = vrot.lane.b32.xlu2 %v1303_v19, %s3201_s14  ;;  %1631 = vrot.lane.b32.xlu0 %v1307_v60, %s2162_s5  ;;  %s3203_s5 = smov 92  }
 0x288   : > { %v2973_v46 = vpop.permute.xlu0 %1463  ;;  %1603 = vrot.lane.b32.xlu1 %v1197_v48, %s3202_s15  ;;  %v3015_v17 = vpop.permute.xlu2 %1491  ;;  %v1418_v48 = vrot.slane %v1405_v43, 4 }
 0x28a   : > { %v1440_v39 = vpop.permute.xlu1 %1439  ;;  %v1419_v61 = vsel %vm526_vm0, %v1418_v48, %v1381_v56 }
 0x28b   : > { %v1679_v20 = vsel %vm1678_vm5, %v1677_v6, %v1440_v39 }
 0x28c   : > { %v1681_v29 = vsel %vm1680_vm6, %v1679_v20, %v2884_v58  ;;  %v1070_v20 = vrot.slane %v2771_v25, 4 }
 0x28e   : > { %1635 = vrot.lane.b32.xlu2 %v1309_v33, %s3203_s5  ;;  %1643 = vrot.lane.b32.xlu0 %v1409_v42, %s2164_s29  ;;  %s3207_s29 = smov 116   ;;  %v1071_v43 = vsel %vm526_vm0, %v1070_v20, %v2762_v13  ;;  %s1766_s5 = scalar_lea.sflag [#allocation4], %s2267_s28 }
 0x290   : > { %v2997_v52 = vpop.permute.xlu0 %1475  ;;  %1615 = vrot.lane.b32.xlu1 %v1299_v0, %s3204_s23  ;;  %v1504_v58 = vpop.permute.xlu2 %1503 }
 0x292   : > { %v1448_v36 = vpop.permute.xlu1 %1447 }
 0x293   : > { %v1683_v10 = vsel %vm1682_vm7, %v1681_v29, %v1448_v36 }
 0x294   : > { %v1685_v63 = vsel %vm1684_vm8, %v1683_v10, %v2944_v38  ;;  %v1412_v38 = vrot.slane %v1369_v50, 4 }
 0x295   : > { %v1687_v40 = vsel %vm3183_vm9, %v1685_v63, %v2911_v21  ;;  %vm3190_vm9 = vcmask 752640  }
 0x296   : > { %1647 = vrot.lane.b32.xlu2 %v1411_v8, %s3205_s18  ;;  %1655 = vrot.lane.b32.xlu0 %v1415_v28, %s2165_s17  ;;  %v1413_v31 = vsel %vm526_vm0, %v2990_v24, %v1412_v38  ;;  %vm3210_vm0 = vcmask 293888  }
 0x298   : > { %v1488_v4 = vpop.permute.xlu0 %1487  ;;  %1627 = vrot.lane.b32.xlu1 %v1305_v30, %s3206_s24  ;;  %v1516_v21 = vpop.permute.xlu2 %1515 }
 0x29a   : > { %v1460_v23 = vpop.permute.xlu1 %1459 }
 0x29b   : > { %v1689_v11 = vsel %vm3179_vm10, %v1687_v40, %v1460_v23  ;;  %vm3186_vm10 = vcmask 621568  }
 0x29c   : > { %v1691_v60 = vsel %vm3176_vm11, %v1689_v11, %v2973_v46  ;;  %vm3182_vm11 = vcmask 523264  }
 0x29d   : > { %v1693_v55 = vsel %vm3177_vm12, %v1691_v60, %v2953_v34  ;;  %vm3185_vm12 = vcmask 556032  }
 0x29e   : > { %1659 = vrot.lane.b32.xlu2 %v1417_v14, %s3207_s29  ;;  %1667 = vrot.lane.b32.xlu0 %v1421_v59, %s2166_s26  ;;  %s1881_s26 = sshll.u32 %s2113_s9, 1 }
 0x29f   : > { %s1777_s2 = sadd.s32 %s1882_s21, %s1881_s26 }
 0x2a0   : > { %v1500_v3 = vpop.permute.xlu0 %1499  ;;  %1639 = vrot.lane.b32.xlu1 %v1407_v45, %s3208_s20  ;;  %v1528_v41 = vpop.permute.xlu2 %1527  ;;  %s1883_s3 = sshll.u32 %s1777_s2, 3  ;;  %s2051_s20 = scalar_lea.hbm %s3161_s1, 256 }
 0x2a1   : > { %s1779_s9 = scalar_lea.hbm %s3161_s1, %s1883_s3 }
 0x2a2   : > { %v1472_v19 = vpop.permute.xlu1 %1471  ;;  %s1783_s15 = sshll.u32 %s1779_s9, 4  ;;  %s1784_s15 = int_to_ptr.hbm [resolvable:$true] %s1783_s15 }
 0x2a3   : > { %v1695_v44 = vsel %vm3178_vm13, %v1693_v55, %v1472_v19  ;;  %vm3184_vm13 = vcmask 588800   ;;  %s2045_s23 = sshra.s32 %s1784_s15, 4  ;;  %s2046_s23 = int_to_ptr.hbm [resolvable:$true] %s2045_s23 }
 0x2a4   : > { %v1697_v46 = vsel %vm3180_vm14, %v1695_v44, %v2997_v52  ;;  %vm3187_vm14 = vcmask 654336   ;;  %s2047_s18 = scalar_lea.hbm %s2046_s23, 16  ;;  %p2052_p7 = scmp.lt.s32.totalorder %s2046_s23, %s3161_s1 }
 0x2a5   : > { %v1699_v22 = vsel %vm3181_vm15, %v1697_v46, %v2983_v54  ;;  %vm3188_vm15 = vcmask 687104   ;;  %p2048_p3 = scmp.ne.s32.totalorder %s2046_s23, %s2047_s18  ;;  %p2053_p8 = scmp.lt.s32.totalorder %s2051_s20, %s2047_s18 }
 0x2a7   : > { %p2049_p5 = pnand %p2048_p3, %p2242_p9  ;;  %p2054_p10 = por %p2053_p8, %p2052_p7 }
 0x2a8   : > { %v1512_v18 = vpop.permute.xlu0 %1511  ;;  %1651 = vrot.lane.b32.xlu1 %v1413_v31, %s3209_s30  ;;  %v1540_v24 = vpop.permute.xlu2 %1539 }
 0x2a9   : > { %p2050_p6 = pneg %p2049_p5 }
 0x2aa   : > { %v1484_v15 = vpop.permute.xlu1 %1483 }
 0x2ab   : > { %v1701_v34 = vsel %vm3182_vm11, %v1699_v22, %v1484_v15  ;;  %vm3189_vm11 = vcmask 719872   ;;  %p2055_p11 = pnand %p2054_p10, %p2050_p6 }
 0x2ac   : > { %v1703_v35 = vsel %vm3185_vm12, %v1701_v34, %v1488_v4  ;;  %vm1718_vm12 = vcmask 818176  }
 0x2ad   : > { %v1705_v37 = vsel %vm3184_vm13, %v1703_v35, %v3015_v17  ;;  %vm3191_vm13 = vcmask 785408  }
 0x2b0   : > { %v1524_v32 = vpop.permute.xlu0 %1523  ;;  %1663 = vrot.lane.b32.xlu1 %v1419_v61, %s2163_s19  ;;  %v1552_v49 = vpop.permute.xlu2 %1551  ;;  %s1879_s19 = sshll.u32 %s2267_s28, 4 }
 0x2b1   : > { %s3077_s17 = scalar_lea.vmem [#allocation5], %s1879_s19 }
 0x2b2   : > { %v1496_v39 = vpop.permute.xlu1 %1495  ;;  %s1781_s10 = sshll.u32 %s3077_s17, 4  ;;  %s1782_s10 = int_to_ptr.vmem [resolvable:$true] %s1781_s10 }
 0x2b3   : > { %v1707_v54 = vsel %vm3186_vm10, %v1705_v37, %v1496_v39  ;;  %vm1720_vm10 = vcmask 850944  }
 0x2b4   : > { %v1709_v33 = vsel %vm3187_vm14, %v1707_v54, %v1500_v3  ;;  %vm1722_vm14 = vcmask 883712  }
 0x2b5   : > { %v1711_v62 = vsel %vm3188_vm15, %v1709_v33, %v1504_v58  ;;  %vm1724_vm15 = vcmask 916480  }
 0x2b8   : > { %v1536_v47 = vpop.permute.xlu0 %1535  ;;  %v1564_v7 = vpop.permute.xlu2 %1563 }
 0x2ba   : > { %v1508_v42 = vpop.permute.xlu1 %1507 }
 0x2bb   : > { %v1713_v0 = vsel %vm3189_vm11, %v1711_v62, %v1508_v42  ;;  %vm1726_vm11 = vcmask 949248  }
 0x2bc   : > { %v1715_v53 = vsel %vm3190_vm9, %v1713_v0, %v1512_v18  ;;  %vm1728_vm9 = vcmask 982016  }
 0x2bd   : > { %v1717_v51 = vsel %vm3191_vm13, %v1715_v53, %v1516_v21  ;;  %vm1730_vm13 = vcmask 1014784  }
 0x2c0   : > { %v1548_v52 = vpop.permute.xlu0 %1547  ;;  %v1576_v30 = vpop.permute.xlu2 %1575 }
 0x2c1   : > { %v1732_v29 = vsel %vm1670_vm1, %v1071_v43, %v1548_v52  ;;  %vm3211_vm1 = vcmask 326656  }
 0x2c2   : > { %v1520_v5 = vpop.permute.xlu1 %1519  ;;  %v1733_v27 = vsel %vm1672_vm2, %v1732_v29, %v1552_v49  ;;  %vm3212_vm2 = vcmask 359424  }
 0x2c3   : > { %v1719_v57 = vsel %vm1718_vm12, %v1717_v51, %v1520_v5 }
 0x2c4   : > { %v1721_v26 = vsel %vm1720_vm10, %v1719_v57, %v1524_v32 }
 0x2c5   : > { %v1723_v2 = vsel %vm1722_vm14, %v1721_v26, %v1528_v41 }
 0x2c8   : > { %v1560_v36 = vpop.permute.xlu0 %1559  ;;  %v1588_v10 = vpop.permute.xlu2 %1587 }
 0x2ca   : > { %v1532_v50 = vpop.permute.xlu1 %1531 }
 0x2cb   : > { %v1725_v8 = vsel %vm1724_vm15, %v1723_v2, %v1532_v50 }
 0x2cc   : > { %v1727_v28 = vsel %vm1726_vm11, %v1725_v8, %v1536_v47 }
 0x2cd   : > { %v1729_v9 = vsel %vm1728_vm9, %v1727_v28, %v1540_v24 }
 0x2d0   : > { %v1572_v12 = vpop.permute.xlu0 %1571  ;;  %v1600_v45 = vpop.permute.xlu2 %1599 }
 0x2d2   : > { %v1544_v17 = vpop.permute.xlu1 %1543 }
 0x2d3   : > { %v1731_v6 = vsel %vm1730_vm13, %v1729_v9, %v1544_v17 }
 0x2d4   : > { %1763 = vst [vmem:[%s3077_s17] sm:$0xff] %v1731_v6 }
 0x2d8   : > { %v1584_v4 = vpop.permute.xlu0 %1583  ;;  %v1612_v38 = vpop.permute.xlu2 %1611 }
 0x2da   : > { %v1556_v56 = vpop.permute.xlu1 %1555 }
 0x2db   : > { %v1734_v16 = vsel %vm1674_vm3, %v1733_v27, %v1556_v56  ;;  %vm3213_vm3 = vcmask 392192  }
 0x2dc   : > { %v1735_v1 = vsel %vm1676_vm4, %v1734_v16, %v1560_v36  ;;  %vm3214_vm4 = vcmask 424960  }
 0x2dd   : > { %v1736_v59 = vsel %vm1678_vm5, %v1735_v1, %v1564_v7  ;;  %vm3215_vm5 = vcmask 457728  }
 0x2e0   : > { %v1596_v14 = vpop.permute.xlu0 %1595  ;;  %v1624_v46 = vpop.permute.xlu2 %1623 }
 0x2e2   : > { %v1568_v23 = vpop.permute.xlu1 %1567 }
 0x2e3   : > { %v1737_v25 = vsel %vm1680_vm6, %v1736_v59, %v1568_v23  ;;  %vm3216_vm6 = vcmask 490496  }
 0x2e4   : > { %v1738_v58 = vsel %vm1682_vm7, %v1737_v25, %v1572_v12  ;;  %vm3217_vm7 = vcmask 523264  }
 0x2e5   : > { %v1739_v3 = vsel %vm1684_vm8, %v1738_v58, %v1576_v30  ;;  %vm3218_vm8 = vcmask 556032  }
 0x2e8   : > { %v1608_v13 = vpop.permute.xlu0 %1607  ;;  %v1636_v35 = vpop.permute.xlu2 %1635 }
 0x2ea   : > { %v1580_v63 = vpop.permute.xlu1 %1579 }
 0x2eb   : > { %v1740_v40 = vsel %vm3210_vm0, %v1739_v3, %v1580_v63  ;;  %vm3219_vm0 = vcmask 588800  }
 0x2ec   : > { %v1741_v19 = vsel %vm3211_vm1, %v1740_v40, %v1584_v4  ;;  %vm3220_vm1 = vcmask 621568  }
 0x2ed   : > { %v1742_v60 = vsel %vm3212_vm2, %v1741_v19, %v1588_v10  ;;  %vm3221_vm2 = vcmask 654336  }
 0x2f0   : > { %v1620_v55 = vpop.permute.xlu0 %1619  ;;  %v1648_v0 = vpop.permute.xlu2 %1647 }
 0x2f2   : > { %v1592_v11 = vpop.permute.xlu1 %1591 }
 0x2f3   : > { %v1743_v31 = vsel %vm3213_vm3, %v1742_v60, %v1592_v11  ;;  %vm3222_vm3 = vcmask 687104  }
 0x2f4   : > { %v1744_v21 = vsel %vm3214_vm4, %v1743_v31, %v1596_v14  ;;  %vm3223_vm4 = vcmask 719872  }
 0x2f5   : > { %v1745_v44 = vsel %vm3215_vm5, %v1744_v21, %v1600_v45  ;;  %vm3224_vm5 = vcmask 752640  }
 0x2f8   : > { %v1632_v61 = vpop.permute.xlu0 %1631  ;;  %v1660_v26 = vpop.permute.xlu2 %1659 }
 0x2fa   : > { %v1604_v18 = vpop.permute.xlu1 %1603 }
 0x2fb   : > { %v1746_v15 = vsel %vm3216_vm6, %v1745_v44, %v1604_v18  ;;  %vm3225_vm6 = vcmask 785408  }
 0x2fc   : > { %v1747_v22 = vsel %vm3217_vm7, %v1746_v15, %v1608_v13 }
 0x2fd   : > { %v1748_v32 = vsel %vm3218_vm8, %v1747_v22, %v1612_v38 }
 0x300   : > { %v1644_v47 = vpop.permute.xlu0 %1643 }
 0x302   : > { %v1616_v48 = vpop.permute.xlu1 %1615 }
 0x303   : > { %v1749_v34 = vsel %vm3219_vm0, %v1748_v32, %v1616_v48 }
 0x304   : > { %v1750_v39 = vsel %vm3220_vm1, %v1749_v34, %v1620_v55 }
 0x305   : > { %v1751_v37 = vsel %vm3221_vm2, %v1750_v39, %v1624_v46 }
 0x308   : > { %v1656_v53 = vpop.permute.xlu0 %1655 }
 0x30a   : > { %v1628_v41 = vpop.permute.xlu1 %1627 }
 0x30b   : > { %v1752_v54 = vsel %vm3222_vm3, %v1751_v37, %v1628_v41 }
 0x30c   : > { %v1753_v33 = vsel %vm3223_vm4, %v1752_v54, %v1632_v61 }
 0x30d   : > { %v1754_v24 = vsel %vm3224_vm5, %v1753_v33, %v1636_v35 }
 0x310   : > { %v1668_v2 = vpop.permute.xlu0 %1667 }
 0x312   : > { %v1640_v42 = vpop.permute.xlu1 %1639 }
 0x313   : > { %v1755_v62 = vsel %vm3225_vm6, %v1754_v24, %v1640_v42 }
 0x314   : > { %v1756_v52 = vsel %vm1718_vm12, %v1755_v62, %v1644_v47 }
 0x315   : > { %v1757_v51 = vsel %vm1720_vm10, %v1756_v52, %v1648_v0 }
 0x31a   : > { %v1652_v5 = vpop.permute.xlu1 %1651 }
 0x31b   : > { %v1758_v57 = vsel %vm1722_vm14, %v1757_v51, %v1652_v5 }
 0x31c   : > { %v1759_v49 = vsel %vm1724_vm15, %v1758_v57, %v1656_v53 }
 0x31d   : > { %v1760_v50 = vsel %vm1726_vm11, %v1759_v49, %v1660_v26 }
 0x322   : > { %v1664_v36 = vpop.permute.xlu1 %1663 }
 0x323   : > { %v1761_v8 = vsel %vm1728_vm9, %v1760_v50, %v1664_v36 }
 0x324   : > { %v1762_v28 = vsel %vm1730_vm13, %v1761_v8, %v1668_v2 }
 0x325   : > { %1764 = vst [vmem:[%s3077_s17 + $0x8] sm:$0xff] %v1762_v28 }
 0x326   : > { %2058 = shalt.err (!%p2055_p11)
}
 0x327   : > { %1888 = dma.vmem_to_hbm [thread:$0]  (%p2242_p9), %s1782_s10, 256, %s1784_s15, %s1766_s5  }
 0x328 PF: > { %p1899_p13 = scmp.ge.s32.totalorder %s2129_s13, 2  ;;  %s1795_s28 = sand.u32 1, %s2101_s6  }
 0x329   : > { %s1796_s17 = scalar_lea.sflag [#allocation4], %s1795_s28 }
 0x32a   : > { %p1895_p0 = pnand %p1899_p13, %p2248_p12 }
 0x32c   : > { %p1896_p1 = pneg %p1895_p0 }
 0x32e   : > { %2096 = dma.done.wait (%p1896_p1), %s1796_s17, 256  }
 0x32f   : > { %2098 = vsyncadd (%p1896_p1), %s1796_s17, 4294967040  ;;  %s17_s13 = sadd.s32 1, %s2129_s13   ;;  %s3226_s22 = sld [smem:[#allocation8_spill]] }
 0x330   : > { %p14_p2 = scmp.ge.s32.totalorder %s17_s13, 18   ;;  %s3227_s6 = smov %s2105_s7 }
 0x331   : > { %s3228_s7 = smov %s2109_s8  ;;  %s3229_s8 = smov %s2255_s27 }
 0x332   : > { %s3230_s9 = smov %s2121_s11  ;;  %s3231_s10 = smov %s2125_s12 }
 0x333   : > { %s3232_s11 = smov %s3235_s16  ;;  %16 = sbr.rel (!%p14_p2) target bundleno = 7 (0x7), region = 76 }
 0x335   : > { %s3233_s12 = smov %s3226_s22 }
 0x338   :  { %1802 = vsyncpa [#allocation3], 1 }
 0x339   :  { %1804 = vsyncpa [#allocation3 + $0x1], 1 }
 0x33a   :  { %1805 = vsyncpa [#allocation4], 1 }
 0x33b   :  { %1807 = vsyncpa [#allocation4 + $0x1], 1 }

</bundles_post_ra>
